<compile_context>
chip_gen: v5e
topology: v5e:2x2
jax: 0.10.0
libtpu: 0.0.40
codegen_flags: <defaults>
</compile_context>

<pallas_src>
import functools

import jax
import jax.numpy as jnp
from jax.experimental import pallas as pl
from jax.experimental.pallas import tpu as pltpu


def _round_up(a: int, b: int) -> int:
    return (a + b - 1) // b * b


def _label_smoothing_kernel(x_ref, t_ref, o_ref, *, smoothing: float):
    """Per-row label-smoothed NLL for one (TILE_N, C) logits tile.

    loss_row = lse(x_row) - sum_c x_row[c] * w_row[c]
    w_row[c] = confidence * [c == target_row] + smoothing / C
    (confidence + smoothing == 1, so the lse coefficient is exactly 1).
    """
    confidence = 1.0 - smoothing
    c = x_ref.shape[-1]
    smooth_over_c = smoothing / c

    x = x_ref[...]                                        # (TILE_N, C), input dtype

    # Sweep 1: row max (stays in the input dtype; cast fused below).
    m = jnp.max(x, axis=-1, keepdims=True)                # (TILE_N, 1)

    # Sweep 2: exp-sum for the logsumexp (f32 accumulation).
    e = jnp.exp((x - m).astype(jnp.float32))              # (TILE_N, C) f32
    s = jnp.sum(e, axis=-1, keepdims=True)                # (TILE_N, 1) f32
    lse = m.astype(jnp.float32) + jnp.log(s)

    # Sweep 3: fused target-"gather" + uniform-smoothing term as ONE weighted
    # reduction (no separate row_sum pass, no one-hot gather pass).
    t = t_ref[...]                                        # (TILE_N, 1) int32
    col = jax.lax.broadcasted_iota(jnp.int32, (1, c), 1)  # (1, C)
    w = jnp.where(col == t, confidence + smooth_over_c, smooth_over_c)
    weighted = jnp.sum(x.astype(jnp.float32) * w, axis=-1, keepdims=True)

    o_ref[...] = lse - weighted                           # (TILE_N, 1) f32


def label_smoothing_loss(x, target, smoothing=0.0, *, tile_n=None):
    """x: [N, C] float logits, target: [N] int class ids -> scalar f32 loss."""
    n, c = x.shape
    itemsize = jnp.dtype(x.dtype).itemsize
    c_lanes = _round_up(c, 128)               # physical lane width of a row in VMEM
    sub = 8 * max(1, 4 // itemsize)           # sublane multiple: 8 f32 / 16 bf16

    if tile_n is None:
        # ~2 MiB per (tile_n, C) input tile, sized on the lane-padded width so
        # double-buffered inputs plus a few full-tile f32 temporaries fit the
        # scoped-VMEM budget on v5e / v6e and v7x (64 MiB).
        tile_n = (2 * 1024 * 1024) // (c_lanes * itemsize)
    tile_n = max(sub, (int(tile_n) // sub) * sub)

    # Keep at least two row blocks for large-enough batches so the "parallel"
    # grid axis can actually shard across both v7x TensorCores.
    if n > 2 * sub:
        tile_n = min(tile_n, max(sub, ((n + 1) // 2 // sub) * sub))

    if tile_n >= n:
        tile_n = n                            # full-extent row block is legal
    num_blocks = pl.cdiv(n, tile_n)

    t_col = target.astype(jnp.int32).reshape(n, 1)

    kernel = functools.partial(_label_smoothing_kernel, smoothing=float(smoothing))

    # VMEM budget: 2 double-buffered input tiles + a few full-tile f32 temps.
    in_tile = tile_n * c_lanes * itemsize
    f32_tile = tile_n * c_lanes * 4
    vmem_limit = int(min(48 * 1024 * 1024,
                         max(16 * 1024 * 1024,
                             2 * in_tile + 6 * f32_tile + (2 << 20))))

    per_row = pl.pallas_call(
        kernel,
        out_shape=jax.ShapeDtypeStruct((n, 1), jnp.float32),
        grid=(num_blocks,),
        in_specs=[
            pl.BlockSpec((tile_n, c), lambda i: (i, 0)),   # logits tile (full C)
            pl.BlockSpec((tile_n, 1), lambda i: (i, 0)),   # targets column
        ],
        out_specs=pl.BlockSpec((tile_n, 1), lambda i: (i, 0)),  # per-row losses
        compiler_params=pltpu.CompilerParams(
            dimension_semantics=("parallel",),   # independent row blocks
            vmem_limit_bytes=vmem_limit,
        ),
        cost_estimate=pl.CostEstimate(
            flops=6 * n * c,
            transcendentals=n * c,
            bytes_accessed=n * c * itemsize + n * 4 + n * 4,
        ),
    )(x, t_col)

    # Tiny final mean in the wrapper; multiply by a precomputed 1/N.
    return jnp.sum(per_row[:, 0]) * jnp.float32(1.0 / n)


def _reference(x, target, smoothing):
    confidence = 1.0 - smoothing
    logprobs = jax.nn.log_softmax(x.astype(jnp.float32), axis=-1)
    nll = -jnp.take_along_axis(logprobs, target[:, None].astype(jnp.int32), axis=-1)[:, 0]
    smooth = -jnp.mean(logprobs, axis=-1)
    return jnp.mean(confidence * nll + smoothing * smooth)


if __name__ == "__main__":
    smoothing = 0.1

    # Primary small case (batch=8, classes=32), matching the module's usage.
    kx, kt = jax.random.split(jax.random.PRNGKey(0))
    N, C = 8, 32
    x = jax.random.normal(kx, (N, C), dtype=jnp.float32)
    target = jax.random.randint(kt, (N,), 0, C, dtype=jnp.int32)

    loss = jax.block_until_ready(label_smoothing_loss(x, target, smoothing=smoothing))
    ref = _reference(x, target, smoothing)
    assert jnp.allclose(loss, ref, atol=1e-4, rtol=1e-5), (loss, ref)

    # Ragged case: C % 128 != 0, N % tile_n != 0 -> multi-block grid with a
    # partial last row block and NO wrapper-side padding.
    kx2, kt2 = jax.random.split(jax.random.PRNGKey(0), 2)
    N2, C2 = 50, 200
    x2 = jax.random.normal(kx2, (N2, C2), dtype=jnp.float32)
    target2 = jax.random.randint(kt2, (N2,), 0, C2, dtype=jnp.int32)

    loss2 = jax.block_until_ready(
        label_smoothing_loss(x2, target2, smoothing=smoothing, tile_n=16))
    ref2 = _reference(x2, target2, smoothing)
    assert jnp.allclose(loss2, ref2, atol=1e-4, rtol=1e-5), (loss2, ref2)

    print("KERNEL_OK")
</pallas_src>

<mosaic_0001>
module attributes {stable_mosaic.version = 11 : i64} {
  func.func @_label_smoothing_kernel(%arg0: i32, %arg1: memref<8x32xf32, #tpu.memory_space<vmem>>, %arg2: memref<8x1xi32, #tpu.memory_space<vmem>>, %arg3: memref<8x1xf32, #tpu.memory_space<vmem>>) attributes {dimension_semantics = [#tpu.dimension_semantics<parallel>], iteration_bounds = array<i64: 1>, scalar_prefetch = 0 : i64, scratch_operands = 0 : i64, tpu.core_type = #tpu.core_type<tc>, window_params = [{transform_indices = @transform_0, window_bounds = array<i64: 8, 32>}, {transform_indices = @transform_1, window_bounds = array<i64: 8, 1>}, {transform_indices = @transform_2, window_bounds = array<i64: 8, 1>}]} {
    %c0 = arith.constant 0 : index
    %c0_0 = arith.constant 0 : index
    %0 = vector.load %arg1[%c0, %c0_0] : memref<8x32xf32, #tpu.memory_space<vmem>>, vector<8x32xf32>
    %cst = arith.constant dense<0xFF800000> : vector<8xf32>
    %1 = vector.multi_reduction <maximumf>, %0, %cst [1] : vector<8x32xf32> to vector<8xf32>
    %2 = vector.shape_cast %1 : vector<8xf32> to vector<8x1xf32>
    %3 = vector.broadcast %2 : vector<8x1xf32> to vector<8x32xf32>
    %4 = arith.subf %0, %3 : vector<8x32xf32>
    %5 = math.exp %4 : vector<8x32xf32>
    %cst_1 = arith.constant dense<0.000000e+00> : vector<8xf32>
    %6 = vector.multi_reduction <add>, %5, %cst_1 [1] : vector<8x32xf32> to vector<8xf32>
    %7 = vector.shape_cast %6 : vector<8xf32> to vector<8x1xf32>
    %8 = math.log %7 : vector<8x1xf32>
    %9 = arith.addf %2, %8 : vector<8x1xf32>
    %c0_2 = arith.constant 0 : index
    %c0_3 = arith.constant 0 : index
    %10 = vector.load %arg2[%c0_2, %c0_3] : memref<8x1xi32, #tpu.memory_space<vmem>>, vector<8x1xi32>
    %11 = tpu.iota {dimensions = array<i32: 1>} : vector<1x32xi32>
    %12 = vector.broadcast %11 : vector<1x32xi32> to vector<8x32xi32>
    %13 = vector.broadcast %10 : vector<8x1xi32> to vector<8x32xi32>
    %14 = arith.cmpi eq, %12, %13 : vector<8x32xi32>
    %cst_4 = arith.constant 0.903124988 : f32
    %cst_5 = arith.constant 3.125000e-03 : f32
    %15 = vector.broadcast %cst_4 : f32 to vector<8x32xf32>
    %16 = vector.broadcast %cst_5 : f32 to vector<8x32xf32>
    %17 = arith.select %14, %15, %16 : vector<8x32xi1>, vector<8x32xf32>
    %18 = arith.mulf %0, %17 : vector<8x32xf32>
    %cst_6 = arith.constant dense<0.000000e+00> : vector<8xf32>
    %19 = vector.multi_reduction <add>, %18, %cst_6 [1] : vector<8x32xf32> to vector<8xf32>
    %20 = vector.shape_cast %19 : vector<8xf32> to vector<8x1xf32>
    %21 = arith.subf %9, %20 : vector<8x1xf32>
    %c0_7 = arith.constant 0 : index
    %c0_8 = arith.constant 0 : index
    %22 = vector.load %arg3[%c0_7, %c0_8] : memref<8x1xf32, #tpu.memory_space<vmem>>, vector<8x1xf32>
    tpu.vector_store %arg3[%c0_7, %c0_8], %21 {strides = array<i32>} : memref<8x1xf32, #tpu.memory_space<vmem>>, vector<8x1xf32>,
    return
  }
  func.func @transform_0(%arg0: i32) -> (i32, i32) {
    %c0_i32 = arith.constant 0 : i32
    %c0_i32_0 = arith.constant 0 : i32
    return %arg0, %c0_i32 : i32, i32
  }
  func.func @transform_1(%arg0: i32) -> (i32, i32) {
    %c0_i32 = arith.constant 0 : i32
    %c0_i32_0 = arith.constant 0 : i32
    return %arg0, %c0_i32 : i32, i32
  }
  func.func @transform_2(%arg0: i32) -> (i32, i32) {
    %c0_i32 = arith.constant 0 : i32
    %c0_i32_0 = arith.constant 0 : i32
    return %arg0, %c0_i32 : i32, i32
  }
}

</mosaic_0001>

<bundles_post_ra>
// kernel: tpu_custom_call.1
= control target key start
LH: loop header
LB: loop body
LE: loop exit
PB: predicated region body
PF: predicated region fallthrough
CT: control target
= control target key end

     0   :  { %vm12_vm0 = vcmask 261120   ;;  %v51_v1 = vmov 0   ;;  %v26_v9 = vlaneseq  ;;  %v52_v12 = vmov 0.003125   ;;  %s80_s0 = inlined_call_operand.vmem [shape: f32[8,32], index: 0, kind: input, shape index: {}]   ;;  %s81_s1 = inlined_call_operand.vmem [shape: s32[8,1], index: 1, kind: input, shape index: {}]   ;;  %s82_s2 = inlined_call_operand.vmem [shape: f32[8,1], index: 2, kind: output, shape index: {}]  }
   0x1   :  { %v11_v0 = vld [vmem:[%s80_s0] sm:$0xff]  ;;  %46 = vset.pattern.permute.xlu0 %v51_v1  ;;  %vm38_vm2 = vcmask 7168  }
   0x2   :  { %v13_v2 = vsel %vm12_vm0, %v11_v0, -inf  ;;  %v25_v3 = vld [vmem:[%s81_s1] sm:$0xff]  ;;  %v27_v10 = vand.u32 127, %v26_v9 }
   0x3   :  { %14 = vmax.xlane.f32.xlu0 %v13_v2 }
  0x17   :  { %29 = vperm.xlu0 %46, %v25_v3  }
  0x76   :  { %v15_v4 = vpop.xlane.xlu0 %14 }
  0x77   :  { %v16_v5 = vsub.f32 %v11_v0, %v15_v4 }
  0x79   :  { %v17_v6 = vmul.f32 1.442695, %v16_v5 }
  0x7b   :  { %47 = vpow2.f32 %v17_v6 }
  0x81   :  { %v48_v7 = vpop.eup %47 }
  0x82   :  { %v19_v8 = vsel %vm12_vm0, %v48_v7, 0.0 }
  0x83   :  { %20 = vadd.xlane.f32.xlu1 %v19_v8 }
  0x89   :  { %v30_v11 = vpop.permute.xlu0 %29 }
  0x8a   :  { %vm31_vm1 = vcmp.eq.s32.totalorder %v27_v10, %v30_v11 }
  0x8b   :  { %v32_v13 = vsel %vm31_vm1, 0.903125, %v52_v12 }
  0x8c   :  { %v33_v14 = vmul.f32 %v32_v13, %v11_v0 }
  0x8e   :  { %v34_v15 = vsel %vm12_vm0, %v33_v14, 0.0 }
  0x8f   :  { %35 = vadd.xlane.f32.xlu1 %v34_v15 }
  0xf6   :  { %v21_v16 = vpop.xlane.xlu1 %20 }
  0xf7   :  { %49 = vlog2.f32 %v21_v16 }
  0xfd   :  { %v50_v17 = vpop.eup %49 }
  0xfe   :  { %v23_v18 = vmul.f32 0.6931472, %v50_v17 }
 0x100   :  { %v24_v19 = vadd.f32 %v23_v18, %v15_v4 }
 0x102   :  { %v36_v20 = vpop.xlane.xlu1 %35 }
 0x103   :  { %v37_v21 = vsub.f32 %v24_v19, %v36_v20 }
 0x105   :  { %39 = vst.msk [vmem:[%s82_s2] sm:$0xff] %vm38_vm2, %v37_v21 }

</bundles_post_ra>
